<compile_context>
chip_gen: v6e
topology: v6e:2x2x1
jax: 0.10.0
libtpu: 0.0.40
codegen_flags: <defaults>
</compile_context>

<pallas_src>
import math

import jax
import jax.numpy as jnp
from jax.experimental import pallas as pl
from jax.experimental.pallas import tpu as pltpu


def _timestep_embed_kernel(t_ref, wf_ref, ph_ref, w1_ref, b1_ref, w2_ref, b2_ref, o_ref):
    # t_ref: (TB, 1) f32   wf_ref/ph_ref: (1, D_in) f32
    t = t_ref[...]

    # Sinusoidal diffusion-step embedding in one shot on a lane-dense (TB, D_in) tile:
    #   sin(t * f_dup + phase) == cat([sin(t*f), cos(t*f)], -1)
    h = jnp.sin(t * wf_ref[...] + ph_ref[...])                       # (TB, D_in) f32

    # fc_t1: Linear(D_in, D_mid) + swish.  MXU operands may be bf16; accumulate in f32.
    z = jnp.dot(h.astype(w1_ref.dtype), w1_ref[...],
                preferred_element_type=jnp.float32) + b1_ref[...]
    z = z * jax.nn.sigmoid(z)                                        # swish in f32 (VPU+EUP)

    # fc_t2: Linear(D_mid, D_out) + swish.
    z = jnp.dot(z.astype(w2_ref.dtype), w2_ref[...],
                preferred_element_type=jnp.float32) + b2_ref[...]
    z = z * jax.nn.sigmoid(z)

    o_ref[...] = z.astype(o_ref.dtype)


def prepare_timestep_embed_params(d_in, W1, b1, W2, b2, *, matmul_dtype=jnp.float32):
    """One-time parameter preparation (call when model params are built, not per step).

    W1: (D_in, D_mid), b1: (D_mid,), W2: (D_mid, D_out), b2: (D_out,)
    (i.e. torch Linear weights already transposed to row-major (in, out) layout).
    """
    half = d_in // 2
    assert 2 * half == d_in, d_in
    # DiffWave-style frequencies: exp(arange(half) * -(ln(1e4) / (half - 1))),
    # duplicated so a single sin covers the sin half (phase 0) and cos half (phase pi/2).
    freqs = jnp.exp(jnp.arange(half, dtype=jnp.float32)
                    * jnp.float32(-math.log(10000.0) / (half - 1)))
    w_full = jnp.concatenate([freqs, freqs]).reshape(1, d_in)
    phase = jnp.concatenate(
        [jnp.zeros((half,), jnp.float32),
         jnp.full((half,), 0.5 * math.pi, jnp.float32)]).reshape(1, d_in)
    return dict(
        w_full=w_full,
        phase=phase,
        W1=W1.astype(matmul_dtype),                 # (D_in,  D_mid)
        b1=b1.reshape(1, -1).astype(jnp.float32),   # (1, D_mid)
        W2=W2.astype(matmul_dtype),                 # (D_mid, D_out)
        b2=b2.reshape(1, -1).astype(jnp.float32),   # (1, D_out)
    )


def _round_up(n, m):
    return ((n + m - 1) // m) * m


def timestep_embedding(timesteps, params, *, block_b=512):
    """timesteps: (B,) or (B, 1) diffusion steps. Returns (B, D_out) float32.

    Batch all trajectory timesteps into one call when possible: at tiny B the kernel is
    launch/DMA-latency bound and a single batched call amortizes that overhead.
    """
    t = jnp.asarray(timesteps).reshape(-1).astype(jnp.float32)
    B = t.shape[0]
    D_in = params["W1"].shape[0]
    D_mid = params["W1"].shape[1]
    D_out = params["W2"].shape[1]

    # Pad B to a full sublane multiple (>= 8); tile the batch so a large B can be split
    # across TensorCores (v7x megacore) via a "parallel" grid axis.
    bb = _round_up(min(block_b, max(B, 8)), 8)
    B_pad = _round_up(B, bb)
    t2d = t.reshape(B, 1)
    if B_pad != B:
        t2d = jnp.pad(t2d, ((0, B_pad - B), (0, 0)))

    grid = (B_pad // bb,)
    out = pl.pallas_call(
        _timestep_embed_kernel,
        out_shape=jax.ShapeDtypeStruct((B_pad, D_out), jnp.float32),
        grid=grid,
        in_specs=[
            pl.BlockSpec((bb, 1), lambda i: (i, 0)),        # timesteps (B_pad, 1)
            pl.BlockSpec((1, D_in), lambda i: (0, 0)),      # duplicated freqs (resident)
            pl.BlockSpec((1, D_in), lambda i: (0, 0)),      # phase
            pl.BlockSpec((D_in, D_mid), lambda i: (0, 0)),  # W1
            pl.BlockSpec((1, D_mid), lambda i: (0, 0)),     # b1
            pl.BlockSpec((D_mid, D_out), lambda i: (0, 0)), # W2
            pl.BlockSpec((1, D_out), lambda i: (0, 0)),     # b2
        ],
        out_specs=pl.BlockSpec((bb, D_out), lambda i: (i, 0)),
        compiler_params=pltpu.CompilerParams(dimension_semantics=("parallel",)),
    )(t2d, params["w_full"], params["phase"],
      params["W1"], params["b1"], params["W2"], params["b2"])
    return out[:B]


def _reference(timesteps, d_in, W1, b1, W2, b2):
    """Pure-JAX reference matching the PyTorch module semantics."""
    t = jnp.asarray(timesteps).reshape(-1, 1).astype(jnp.float32)
    half = d_in // 2
    freqs = jnp.exp(jnp.arange(half, dtype=jnp.float32)
                    * jnp.float32(-math.log(10000.0) / (half - 1)))
    h = t * freqs[None, :]
    h = jnp.concatenate([jnp.sin(h), jnp.cos(h)], axis=-1)    # calc_diffusion_step_embedding
    z = h @ W1 + b1
    z = z * jax.nn.sigmoid(z)                                  # swish(fc_t1(.))
    z = z @ W2 + b2
    return z * jax.nn.sigmoid(z)                               # swish(fc_t2(.))


if __name__ == "__main__":
    # Small shapes consistent with the module's hyperparameters.
    D_in, D_mid, D_out = 32, 128, 64        # Diff_step_embed_in / _mid / _out
    B = 2

    key = jax.random.PRNGKey(0)
    k_t, k_w1, k_b1, k_w2, k_b2 = jax.random.split(key, 5)

    # Parameters (deterministic synthetic init; (in, out) row-major layout).
    W1 = jax.random.normal(k_w1, (D_in, D_mid), dtype=jnp.float32) * 0.05
    b1 = jax.random.normal(k_b1, (D_mid,), dtype=jnp.float32) * 0.05
    W2 = jax.random.normal(k_w2, (D_mid, D_out), dtype=jnp.float32) * 0.05
    b2 = jax.random.normal(k_b2, (D_out,), dtype=jnp.float32) * 0.05

    # Diffusion timesteps, shape (B,)
    timesteps = jax.random.randint(k_t, (B,), 0, 1000).astype(jnp.float32)
    ref = _reference(timesteps, D_in, W1, b1, W2, b2)

    # 1) f32 path: exact module semantics.
    p_f32 = prepare_timestep_embed_params(D_in, W1, b1, W2, b2, matmul_dtype=jnp.float32)
    out = jax.block_until_ready(timestep_embedding(timesteps, p_f32))
    assert out.shape == (B, D_out), out.shape
    assert jnp.allclose(out, ref, atol=2e-4, rtol=2e-4), "f32 mismatch vs reference"

    # 2) bf16-MXU fast path (v6e/v7x): bf16 matmul operands, f32 accumulation,
    #    elementwise sin / sigmoid kept in f32.
    p_bf16 = prepare_timestep_embed_params(D_in, W1, b1, W2, b2, matmul_dtype=jnp.bfloat16)
    out_bf16 = jax.block_until_ready(timestep_embedding(timesteps, p_bf16))
    assert jnp.allclose(out_bf16, ref, atol=5e-2, rtol=5e-2), "bf16 mismatch vs reference"

    # 3) Batched-trajectory call (amortizes launch/DMA overhead); tiny block_b here just
    #    to exercise the multi-block parallel grid + sublane padding path.
    B_big = 20
    t_big = jax.random.randint(jax.random.PRNGKey(1), (B_big,), 0, 1000).astype(jnp.float32)
    out_big = jax.block_until_ready(timestep_embedding(t_big, p_f32, block_b=8))
    ref_big = _reference(t_big, D_in, W1, b1, W2, b2)
    assert out_big.shape == (B_big, D_out), out_big.shape
    assert jnp.allclose(out_big, ref_big, atol=2e-4, rtol=2e-4), "batched mismatch vs reference"

    print("KERNEL_OK")
</pallas_src>

<mosaic_0001>
module attributes {stable_mosaic.version = 11 : i64} {
  func.func @_timestep_embed_kernel(%arg0: i32, %arg1: memref<8x1xf32, #tpu.memory_space<vmem>>, %arg2: memref<1x32xf32, #tpu.memory_space<vmem>>, %arg3: memref<1x32xf32, #tpu.memory_space<vmem>>, %arg4: memref<32x128xf32, #tpu.memory_space<vmem>>, %arg5: memref<1x128xf32, #tpu.memory_space<vmem>>, %arg6: memref<128x64xf32, #tpu.memory_space<vmem>>, %arg7: memref<1x64xf32, #tpu.memory_space<vmem>>, %arg8: memref<8x64xf32, #tpu.memory_space<vmem>>) attributes {dimension_semantics = [#tpu.dimension_semantics<parallel>], iteration_bounds = array<i64: 1>, scalar_prefetch = 0 : i64, scratch_operands = 0 : i64, tpu.core_type = #tpu.core_type<tc>, window_params = [{transform_indices = @transform_0, window_bounds = array<i64: 8, 1>}, {pipeline_mode = #tpu.pipeline_mode<synchronous>, transform_indices = @transform_1, window_bounds = array<i64: 1, 32>}, {pipeline_mode = #tpu.pipeline_mode<synchronous>, transform_indices = @transform_2, window_bounds = array<i64: 1, 32>}, {pipeline_mode = #tpu.pipeline_mode<synchronous>, transform_indices = @transform_3, window_bounds = array<i64: 32, 128>}, {pipeline_mode = #tpu.pipeline_mode<synchronous>, transform_indices = @transform_4, window_bounds = array<i64: 1, 128>}, {pipeline_mode = #tpu.pipeline_mode<synchronous>, transform_indices = @transform_5, window_bounds = array<i64: 128, 64>}, {pipeline_mode = #tpu.pipeline_mode<synchronous>, transform_indices = @transform_6, window_bounds = array<i64: 1, 64>}, {transform_indices = @transform_7, window_bounds = array<i64: 8, 64>}]} {
    %c0 = arith.constant 0 : index
    %c0_0 = arith.constant 0 : index
    %0 = vector.load %arg1[%c0, %c0_0] : memref<8x1xf32, #tpu.memory_space<vmem>>, vector<8x1xf32>
    %c0_1 = arith.constant 0 : index
    %c0_2 = arith.constant 0 : index
    %1 = vector.load %arg2[%c0_1, %c0_2] : memref<1x32xf32, #tpu.memory_space<vmem>>, vector<1x32xf32>
    %2 = vector.broadcast %0 : vector<8x1xf32> to vector<8x32xf32>
    %3 = vector.broadcast %1 : vector<1x32xf32> to vector<8x32xf32>
    %4 = arith.mulf %2, %3 : vector<8x32xf32>
    %c0_3 = arith.constant 0 : index
    %c0_4 = arith.constant 0 : index
    %5 = vector.load %arg3[%c0_3, %c0_4] : memref<1x32xf32, #tpu.memory_space<vmem>>, vector<1x32xf32>
    %6 = vector.broadcast %5 : vector<1x32xf32> to vector<8x32xf32>
    %7 = arith.addf %4, %6 : vector<8x32xf32>
    %8 = math.sin %7 : vector<8x32xf32>
    %c0_5 = arith.constant 0 : index
    %c0_6 = arith.constant 0 : index
    %9 = vector.load %arg4[%c0_5, %c0_6] : memref<32x128xf32, #tpu.memory_space<vmem>>, vector<32x128xf32>
    %cst = arith.constant dense<0.000000e+00> : vector<8x128xf32>
    %10 = tpu.matmul %8, %9, %cst {dimension_numbers = #tpu.dot_dimension_numbers<[1], [0], [0], [1], [0, 0, 1, 1], [], []>} : vector<8x32xf32>, vector<32x128xf32>, vector<8x128xf32> -> vector<8x128xf32>
    %c0_7 = arith.constant 0 : index
    %c0_8 = arith.constant 0 : index
    %11 = vector.load %arg5[%c0_7, %c0_8] : memref<1x128xf32, #tpu.memory_space<vmem>>, vector<1x128xf32>
    %12 = vector.broadcast %11 : vector<1x128xf32> to vector<8x128xf32>
    %13 = arith.addf %10, %12 : vector<8x128xf32>
    %14 = arith.negf %13 : vector<8x128xf32>
    %15 = math.exp %14 : vector<8x128xf32>
    %cst_9 = arith.constant 1.000000e+00 : f32
    %16 = vector.broadcast %cst_9 : f32 to vector<8x128xf32>
    %17 = arith.addf %16, %15 : vector<8x128xf32>
    %18 = arith.divf %16, %17 : vector<8x128xf32>
    %19 = arith.mulf %13, %18 : vector<8x128xf32>
    %c0_10 = arith.constant 0 : index
    %c0_11 = arith.constant 0 : index
    %20 = vector.load %arg6[%c0_10, %c0_11] : memref<128x64xf32, #tpu.memory_space<vmem>>, vector<128x64xf32>
    %cst_12 = arith.constant dense<0.000000e+00> : vector<8x64xf32>
    %21 = tpu.matmul %19, %20, %cst_12 {dimension_numbers = #tpu.dot_dimension_numbers<[1], [0], [0], [1], [0, 0, 1, 1], [], []>} : vector<8x128xf32>, vector<128x64xf32>, vector<8x64xf32> -> vector<8x64xf32>
    %c0_13 = arith.constant 0 : index
    %c0_14 = arith.constant 0 : index
    %22 = vector.load %arg7[%c0_13, %c0_14] : memref<1x64xf32, #tpu.memory_space<vmem>>, vector<1x64xf32>
    %23 = vector.broadcast %22 : vector<1x64xf32> to vector<8x64xf32>
    %24 = arith.addf %21, %23 : vector<8x64xf32>
    %25 = arith.negf %24 : vector<8x64xf32>
    %26 = math.exp %25 : vector<8x64xf32>
    %cst_15 = arith.constant 1.000000e+00 : f32
    %27 = vector.broadcast %cst_15 : f32 to vector<8x64xf32>
    %28 = arith.addf %27, %26 : vector<8x64xf32>
    %29 = arith.divf %27, %28 : vector<8x64xf32>
    %30 = arith.mulf %24, %29 : vector<8x64xf32>
    %c0_16 = arith.constant 0 : index
    %c0_17 = arith.constant 0 : index
    %31 = vector.load %arg8[%c0_16, %c0_17] : memref<8x64xf32, #tpu.memory_space<vmem>>, vector<8x64xf32>
    tpu.vector_store %arg8[%c0_16, %c0_17], %30 {strides = array<i32>} : memref<8x64xf32, #tpu.memory_space<vmem>>, vector<8x64xf32>,
    return
  }
  func.func @transform_0(%arg0: i32) -> (i32, i32) {
    %c0_i32 = arith.constant 0 : i32
    %c0_i32_0 = arith.constant 0 : i32
    return %arg0, %c0_i32 : i32, i32
  }
  func.func @transform_1(%arg0: i32) -> (i32, i32) {
    %c0_i32 = arith.constant 0 : i32
    %c0_i32_0 = arith.constant 0 : i32
    %c0_i32_1 = arith.constant 0 : i32
    return %c0_i32, %c0_i32_0 : i32, i32
  }
  func.func @transform_2(%arg0: i32) -> (i32, i32) {
    %c0_i32 = arith.constant 0 : i32
    %c0_i32_0 = arith.constant 0 : i32
    %c0_i32_1 = arith.constant 0 : i32
    return %c0_i32, %c0_i32_0 : i32, i32
  }
  func.func @transform_3(%arg0: i32) -> (i32, i32) {
    %c0_i32 = arith.constant 0 : i32
    %c0_i32_0 = arith.constant 0 : i32
    %c0_i32_1 = arith.constant 0 : i32
    return %c0_i32, %c0_i32_0 : i32, i32
  }
  func.func @transform_4(%arg0: i32) -> (i32, i32) {
    %c0_i32 = arith.constant 0 : i32
    %c0_i32_0 = arith.constant 0 : i32
    %c0_i32_1 = arith.constant 0 : i32
    return %c0_i32, %c0_i32_0 : i32, i32
  }
  func.func @transform_5(%arg0: i32) -> (i32, i32) {
    %c0_i32 = arith.constant 0 : i32
    %c0_i32_0 = arith.constant 0 : i32
    %c0_i32_1 = arith.constant 0 : i32
    return %c0_i32, %c0_i32_0 : i32, i32
  }
  func.func @transform_6(%arg0: i32) -> (i32, i32) {
    %c0_i32 = arith.constant 0 : i32
    %c0_i32_0 = arith.constant 0 : i32
    %c0_i32_1 = arith.constant 0 : i32
    return %c0_i32, %c0_i32_0 : i32, i32
  }
  func.func @transform_7(%arg0: i32) -> (i32, i32) {
    %c0_i32 = arith.constant 0 : i32
    %c0_i32_0 = arith.constant 0 : i32
    return %arg0, %c0_i32 : i32, i32
  }
}

</mosaic_0001>

<bundles_post_ra>
// kernel: tpu_custom_call.1
= control target key start
LH: loop header
LB: loop body
LE: loop exit
PB: predicated region body
PF: predicated region fallthrough
CT: control target
= control target key end

     0   :  { %v489_v1 = vmov 0   ;;  %s660_s0 = inlined_call_operand.vmem [shape: f32[8,1], index: 0, kind: input, shape index: {}]   ;;  %s661_s1 = inlined_call_operand.vmem [shape: f32[1,32], index: 1, kind: input, shape index: {}]   ;;  %s662_s2 = inlined_call_operand.vmem [shape: f32[1,32], index: 2, kind: input, shape index: {}]   ;;  %s663_s3 = inlined_call_operand.vmem [shape: f32[32,128], index: 3, kind: input, shape index: {}]   ;;  %s664_s4 = inlined_call_operand.vmem [shape: f32[1,128], index: 4, kind: input, shape index: {}]   ;;  %s665_s5 = inlined_call_operand.vmem [shape: f32[128,64], index: 5, kind: input, shape index: {}]   ;;  %s666_s6 = inlined_call_operand.vmem [shape: f32[1,64], index: 6, kind: input, shape index: {}]   ;;  %s667_s7 = inlined_call_operand.hbm [shape: f32[8,64], index: 7, kind: output, shape index: {}]  }
   0x1   :  { %v27_v0 = vld [vmem:[%s660_s0] sm:$0xff]  ;;  %454 = vset.pattern.permute.xlu0 %v489_v1 }
   0x2   :  { %31 = vperm.xlu0 %454, %v27_v0  }
   0x3   :  { %12 = vsyncpa [#allocation3], 0  ;;  %v156_v2 = vld [vmem:[%s663_s3 + $0x18] sm:$0xff]  ;;  %v490_v3 = vmov 0.0   ;;  %v155_v4 = vld [vmem:[%s663_s3 + $0x10] sm:$0xff]  ;;  %vm491_vm0 = vmmov 0  }
   0x4   :  { %394 = vmatprep.subr.mxu0 %v490_v3  ;;  %402 = vmatprep.mubr.msk.f32.mxu0 %vm491_vm0, %v490_v3  ;;  %v154_v5 = vld [vmem:[%s663_s3 + $0x8] sm:$0xff]  ;;  %v153_v6 = vld [vmem:[%s663_s3] sm:$0xff]  ;;  %v492_v23 = vmov 2102212464   ;;  %v493_v25 = vmov 920167782  }
   0x5   :  { %395 = vmatpush3.msra.mxu0 %v156_v2  ;;  %405 = vmatprep.subr.mxu1 %v490_v3  ;;  %v361_v7 = vld [vmem:[%s661_s1] ss:$0 sm:$0xff]  ;;  %v494_v29 = vmov 1326507024   ;;  %v495_v31 = vmov 683565275  }
   0x6   :  { %396 = vmatprep.subr.mxu0 %v490_v3  ;;  %437 = vmatprep.mubr.msk.f32.mxu1 %vm491_vm0, %v490_v3  ;;  %v362_v8 = vld [vmem:[%s662_s2] ss:$0 sm:$0xff]  ;;  %v496_v33 = vmov 2475754826   ;;  %v497_v36 = vmov 2131351028  }
   0x7   :  { %397 = vmatpush3.msra.mxu0 %v155_v4  ;;  %vm164_vm13 = vcmask 261120   ;;  %vm345_vm15 = vcmask 523264  }
   0x8   :  { %398 = vmatprep.subr.mxu0 %v490_v3 }
   0x9   :  { %399 = vmatpush3.msra.mxu0 %v154_v5 }
   0xa   :  { %400 = vmatprep.subr.mxu0 %v490_v3 }
   0xb   :  { %401 = vmatpush3.msra.mxu0 %v153_v6 }
  0x7d   :  { %v32_v9 = vpop.permute.xlu0 %31 }
  0x7e   :  { %v40_v10 = vmul.f32 %v361_v7, %v32_v9 }
  0x80   :  { %v567_v11 = vadd.f32 %v362_v8, %v40_v10 }
  0x82   :  { %v52_v12 = vand.u32 2139095040, %v567_v11  ;;  %v49_v13 = vand.u32 2147483647, %v567_v11  ;;  %vm51_vm8 = vcmp.lt.s32.totalorder %v567_v11, 0  ;;  %vm141_vm14 = vweird.f32 %v567_v11 }
  0x84   :  { %v53_v14 = vshrl.u32 %v52_v12, 23  ;;  %v56_v16 = vand.u32 8388607, %v49_v13  ;;  %vm50_vm9 = vcmp.le.f32.partialorder %v49_v13, 0.7853982 }
  0x86   :  { %v363_v15 = vadd.s32 4294967169, %v53_v14  ;;  %v57_v19 = vor.u32 8388608, %v56_v16 }
  0x88   :  { %v59_v17 = vadd.s32 1, %v363_v15  ;;  %v97_v27 = vshll.u32 %v57_v19, 8 }
  0x8a   :  { %vm60_vm1 = vcmp.gt.s32.totalorder %v59_v17, 0 }
  0x8b   :  { %v61_v18 = vsel %vm60_vm1, %v59_v17, 0 }
  0x8c   :  { %v63_v20 = vand.u32 31, %v61_v18  ;;  %v62_v21 = vshrl.u32 %v61_v18, 5 }
  0x8e   :  { %v64_v22 = vsub.s32 32, %v63_v20  ;;  %v75_v24 = vshll.u32 %v492_v23, %v63_v20  ;;  %v78_v26 = vshll.u32 %v493_v25, %v63_v20  ;;  %v66_v32 = vshll.u32 %v495_v31, %v63_v20 }
  0x8f   :  { %v69_v35 = vshll.u32 %v496_v33, %v63_v20  ;;  %v72_v38 = vshll.u32 %v497_v36, %v63_v20  ;;  %vm84_vm2 = vcmp.lt.s32.totalorder %v62_v21, 4  ;;  %vm81_vm3 = vcmp.lt.s32.totalorder %v62_v21, 1 }
  0x90   :  { %v76_v28 = vshrl.u32 %v493_v25, %v64_v22  ;;  %v79_v30 = vshrl.u32 %v494_v29, %v64_v22  ;;  %v67_v34 = vshrl.u32 %v496_v33, %v64_v22  ;;  %v70_v37 = vshrl.u32 %v497_v36, %v64_v22 }
  0x91   :  { %v73_v39 = vshrl.u32 %v492_v23, %v64_v22  ;;  %v65_v43 = vshrl.u32 %v495_v31, %v64_v22  ;;  %vm82_vm4 = vcmp.lt.s32.totalorder %v62_v21, 2  ;;  %vm83_vm5 = vcmp.lt.s32.totalorder %v62_v21, 3 }
  0x92   :  { %v77_v40 = vor.u32 %v76_v28, %v75_v24  ;;  %v80_v41 = vor.u32 %v79_v30, %v78_v26  ;;  %v68_v42 = vor.u32 %v67_v34, %v66_v32  ;;  %v71_v44 = vor.u32 %v70_v37, %v69_v35 }
  0x93   :  { %v74_v45 = vor.u32 %v73_v39, %v72_v38 }
  0x94   :  { %v90_v46 = vsel %vm84_vm2, %v77_v40, 920167782  ;;  %v94_v47 = vsel %vm84_vm2, %v80_v41, 1326507024  ;;  %v89_v49 = vsel %vm81_vm3, %v68_v42, %v71_v44  ;;  %v85_v52 = vsel %vm81_vm3, %v65_v43, %v68_v42  ;;  %v260_v41 = vld [vmem:[%s665_s5 + $0x78] sm:$0xff]  ;;  %v259_v42 = vld [vmem:[%s665_s5 + $0x70] sm:$0xff] }
  0x95   :  { %v86_v48 = vsel %vm84_vm2, %v74_v45, 2102212464  ;;  %v91_v50 = vsel %vm83_vm5, %v74_v45, %v90_v46  ;;  %v93_v51 = vsel %vm81_vm3, %v71_v44, %v74_v45  ;;  %v95_v55 = vsel %vm83_vm5, %v77_v40, %v94_v47  ;;  %406 = vmatpush3.msra.mxu1 %v260_v41  ;;  %v257_v43 = vld [vmem:[%s665_s5 + $0x60] sm:$0xff]  ;;  %v255_v45 = vld [vmem:[%s665_s5 + $0x50] sm:$0xff]  ;;  %v254_v46 = vld [vmem:[%s665_s5 + $0x48] sm:$0xff] }
  0x96   :  { %v87_v53 = vsel %vm83_vm5, %v71_v44, %v86_v48  ;;  %v92_v54 = vsel %vm82_vm4, %v89_v49, %v91_v50  ;;  %v96_v56 = vsel %vm82_vm4, %v93_v51, %v95_v55  ;;  %407 = vmatprep.subr.mxu1 %v490_v3  ;;  %v256_v44 = vld [vmem:[%s665_s5 + $0x58] sm:$0xff]  ;;  %v253_v47 = vld [vmem:[%s665_s5 + $0x40] sm:$0xff]  ;;  %v251_v49 = vld [vmem:[%s665_s5 + $0x30] sm:$0xff] }
  0x97   :  { %v573_v57 = vmul.u32.u64.low %v97_v27, %v92_v54  ;;  %v574_v58 = vmul.u32.u64.high %v97_v27, %v92_v54, %v573_v57  ;;  %v576_v59 = vmul.u32.u64.low %v97_v27, %v96_v56  ;;  %v577_v60 = vmul.u32.u64.high %v97_v27, %v96_v56, %v576_v59  ;;  %408 = vmatpush3.msra.mxu1 %v259_v42  ;;  %v252_v48 = vld [vmem:[%s665_s5 + $0x38] sm:$0xff]  ;;  %v250_v50 = vld [vmem:[%s665_s5 + $0x28] sm:$0xff]  ;;  %v249_v51 = vld [vmem:[%s665_s5 + $0x20] sm:$0xff] }
  0x98   :  { %v88_v61 = vsel %vm82_vm4, %v85_v52, %v87_v53  ;;  %409 = vmatprep.subr.mxu1 %v490_v3  ;;  %v248_v52 = vld [vmem:[%s665_s5 + $0x18] sm:$0xff]  ;;  %v247_v53 = vld [vmem:[%s665_s5 + $0x10] sm:$0xff]  ;;  %v246_v54 = vld [vmem:[%s665_s5 + $0x8] sm:$0xff] }
  0x99   :  { %v107_v62 = vadd.s32 1, %v574_v58  ;;  %v104_v63 = vmul.u32 %v97_v27, %v88_v61  ;;  %vm106_vm6 = vc.u32 %v577_v60, %v573_v57  ;;  %v105_v14 = vadd.s32 %v573_v57, %v577_v60  ;;  %v245_v55 = vld [vmem:[%s665_s5] sm:$0xff] }
  0x9a   :  { %v367_v56 = vld [vmem:[%s664_s4] ss:$0 sm:$0xff]  ;;  %s498_s4 = smov [#allocation2]  }
  0x9b   :  { %v108_v0 = vsel %vm106_vm6, %v107_v62, %v574_v58  ;;  %s353_s19 = sshll.u32 %s498_s4, 4  ;;  %s354_s19 = int_to_ptr.vmem [resolvable:$true] %s353_s19 }
  0x9c   :  { %v109_v1 = vadd.s32 %v108_v0, %v104_v63  ;;  %s467_s20 = scalar_lea.vmem %s354_s19, 128  ;;  %p472_p1 = scmp.lt.s32.totalorder %s354_s19, %s354_s19 }
  0x9d   :  { %p468_p0 = scmp.ne.s32.totalorder %s354_s19, %s467_s20  ;;  %p473_p2 = scmp.lt.s32.totalorder %s467_s20, %s467_s20 }
  0x9e   :  { %v110_v2 = vadd.s32 536870912, %v109_v1 }
  0x9f   :  { %p474_p3 = por %p473_p2, %p472_p1 }
  0xa0   :  { %v111_v4 = vshrl.u32 %v110_v2, 30 }
  0xa1   :  { %p475_p4 = pnand %p474_p3, %p468_p0 }
  0xa2   :  { %v112_v5 = vshll.u32 %v111_v4, 30  ;;  %v135_v27 = vsub.s32 4, %v111_v4 }
  0xa4   :  { %v113_v6 = vsub.s32 %v109_v1, %v112_v5  ;;  %v136_v30 = vsel %vm51_vm8, %v135_v27, %v111_v4 }
  0xa5   :  { %v138_v31 = vsel %vm50_vm9, 0, %v136_v30 }
  0xa6   :  { %v115_v7 = vsub.s32 0, %v113_v6  ;;  %v142_v32 = vadd.s32 3, %v138_v31 }
  0xa8   :  { %v364_v8 = vmin.u32 %v115_v7, %v113_v6  ;;  %v143_v33 = vand.u32 3, %v142_v32 }
  0xaa   :  { %v117_v9 = vclz %v364_v8  ;;  %vm148_vm10 = vcmp.eq.s32.totalorder %v143_v33, 2  ;;  %vm145_vm11 = vcmp.eq.s32.totalorder %v143_v33, 0  ;;  %vm144_vm12 = vcmp.lt.s32.totalorder %v143_v33, 2 }
  0xac   :  { %v365_v10 = vadd.s32 4294967294, %v117_v9 }
  0xae   :  { %vm366_vm7 = vcmp.lt.s32.totalorder %v365_v10, 0 }
  0xaf   :  { %v120_v12 = vsel %vm366_vm7, 0, %v365_v10 }
  0xb0   :  { %v121_v15 = vsub.s32 32, %v120_v12  ;;  %v125_v16 = vsub.s32 4294967266, %v120_v12  ;;  %v122_v17 = vshll.u32 %v113_v6, %v120_v12 }
  0xb2   :  { %v123_v18 = vshrl.u32 %v105_v14, %v121_v15  ;;  %v126_v19 = vadd.s32 127, %v125_v16 }
  0xb4   :  { %v124_v20 = vor.u32 %v123_v18, %v122_v17  ;;  %v127_v21 = vshll.u32 %v126_v19, 23 }
  0xb6   :  { %v128_v22 = vor.u32 4788187, %v127_v21  ;;  %v131_v24 = vcvt.s32.f32 %v124_v20 }
  0xb8   :  { %v129_v23 = vand.u32 2147483647, %v128_v22 }
  0xba   :  { %v132_v25 = vmul.f32 %v131_v24, %v129_v23 }
  0xbc   :  { %v133_v26 = vxor.u32 2147483648, %v132_v25 }
  0xbe   :  { %v134_v28 = vsel %vm51_vm8, %v133_v26, %v132_v25 }
  0xbf   :  { %v137_v29 = vsel %vm50_vm9, %v567_v11, %v134_v28  ;;  %v258_v11 = vld [vmem:[%s665_s5 + $0x68] sm:$0xff] }
  0xc0   :  { %455 = vcosq.f32 %v137_v29  ;;  %410 = vmatpush3.msra.mxu1 %v258_v11 }
  0xc1   :  { %457 = vsinq.f32 %v137_v29  ;;  %411 = vmatprep.subr.mxu1 %v490_v3 }
  0xc2   :  { %412 = vmatpush3.msra.mxu1 %v257_v43 }
  0xc3   :  { %413 = vmatprep.subr.mxu1 %v490_v3 }
  0xc4   :  { %414 = vmatpush3.msra.mxu1 %v256_v44 }
  0xc5   :  { %415 = vmatprep.subr.mxu1 %v490_v3 }
  0xc6   :  { %416 = vmatpush3.msra.mxu1 %v255_v45 }
  0xc7   :  { %417 = vmatprep.subr.mxu1 %v490_v3 }
  0xc8   :  { %418 = vmatpush3.msra.mxu1 %v254_v46 }
  0xc9   :  { %419 = vmatprep.subr.mxu1 %v490_v3 }
  0xca   :  { %420 = vmatpush3.msra.mxu1 %v253_v47 }
  0xcb   :  { %421 = vmatprep.subr.mxu1 %v490_v3 }
  0xcc   :  { %422 = vmatpush3.msra.mxu1 %v252_v48 }
  0xcd   :  { %v456_v34 = vpop.eup %455  ;;  %423 = vmatprep.subr.mxu1 %v490_v3 }
  0xce   :  { %v458_v35 = vpop.eup %457  ;;  %v149_v36 = vxor.u32 2147483648, %v456_v34  ;;  %424 = vmatpush3.msra.mxu1 %v251_v49 }
  0xcf   :  { %v146_v37 = vxor.u32 2147483648, %v458_v35  ;;  %425 = vmatprep.subr.mxu1 %v490_v3 }
  0xd0   :  { %v150_v38 = vsel %vm148_vm10, %v149_v36, %v458_v35  ;;  %426 = vmatpush3.msra.mxu1 %v250_v50 }
  0xd1   :  { %v147_v39 = vsel %vm145_vm11, %v456_v34, %v146_v37  ;;  %427 = vmatprep.subr.mxu1 %v490_v3 }
  0xd2   :  { %v151_v13 = vsel %vm144_vm12, %v147_v39, %v150_v38  ;;  %428 = vmatpush3.msra.mxu1 %v249_v51 }
  0xd3   :  { %v152_v40 = vsel %vm141_vm14, nan, %v151_v13  ;;  %429 = vmatprep.subr.mxu1 %v490_v3 }
  0xd4   :  { %403 = vmatmul.mubr.msk.f32.vlgmr.msra.gmra.mxu0 %vm164_vm13, %v152_v40  ;;  %430 = vmatpush3.msra.mxu1 %v248_v52 }
  0xd5   :  { %431 = vmatprep.subr.mxu1 %v490_v3 }
  0xd6   :  { %432 = vmatpush3.msra.mxu1 %v247_v53 }
  0xd7   :  { %433 = vmatprep.subr.mxu1 %v490_v3 }
  0xd8   :  { %434 = vmatpush3.msra.mxu1 %v246_v54 }
  0xd9   :  { %435 = vmatprep.subr.mxu1 %v490_v3  ;;  %v370_v3 = vld [vmem:[%s666_s6] ss:$0 sm:$0xff] }
  0xda   :  { %436 = vmatpush3.msra.mxu1 %v245_v55 }
 0x194   :  { %v234_v57 = vpop.f32.mrf.mxu0 }
 0x195   :  { %v235_v58 = vadd.f32 %v367_v56, %v234_v57 }
 0x196   :  { %v404_v59 = vpop.f32.mrf.mxu0 }
 0x197   :  { %v369_v60 = vmul.f32 -1.442695, %v235_v58 }
 0x199   :  { %459 = vpow2.f32 %v369_v60 }
 0x1a6   :  { %v460_v61 = vpop.eup %459 }
 0x1a7   :  { %v241_v62 = vadd.f32 1.0, %v460_v61 }
 0x1a9   :  { %461 = vrcp.f32 %v241_v62 }
 0x1b6   :  { %v462_v63 = vpop.eup %461 }
 0x1b7   :  { %v244_v0 = vmul.f32 %v462_v63, %v235_v58 }
 0x1b9   :  { %438 = vmatmul.mubr.f32.vlgmr.msra.gmra.mxu1 %v244_v0 }
 0x279   :  { %v334_v1 = vpop.f32.mrf.mxu1 }
 0x27a   :  { %v335_v2 = vadd.f32 %v370_v3, %v334_v1 }
 0x27b   :  { %v439_v4 = vpop.f32.mrf.mxu1 }
 0x27c   :  { %v371_v5 = vmul.f32 -1.442695, %v335_v2 }
 0x27e   :  { %463 = vpow2.f32 %v371_v5 }
 0x28b   :  { %v464_v6 = vpop.eup %463 }
 0x28c   :  { %v341_v7 = vadd.f32 1.0, %v464_v6 }
 0x28e   :  { %465 = vrcp.f32 %v341_v7 }
 0x29b   :  { %v466_v8 = vpop.eup %465 }
 0x29c   :  { %v344_v9 = vmul.f32 %v466_v8, %v335_v2 }
 0x29e   :  { %346 = vst.msk [vmem:[#allocation2] sm:$0xff] %vm345_vm15, %v344_v9 }
 0x29f   :  { %478 = shalt.err (!%p475_p4)
}
 0x2a0   :  { %356 = dma.vmem_to_hbm [thread:$0]  %s354_s19, 128, %s667_s7, [#allocation3]  }
 0x2a1   :  { %487 = dma.done.wait [#allocation3], 128  }
 0x2a2   :  { %488 = vsyncadd [#allocation3], 4294967168 }
 0x2a3   :  { %360 = vsyncpa [#allocation3], 1 }

</bundles_post_ra>
